<compile_context>
chip_gen: v7x
topology: tpu7x:2x2x1
jax: 0.10.0
libtpu: 0.0.40
codegen_flags: <defaults>
</compile_context>

<pallas_src>
import functools

import jax
import jax.numpy as jnp
from jax.experimental import pallas as pl
from jax.experimental.pallas import tpu as pltpu


_VMEM_PLAN_BYTES = 24 * 1024 * 1024    # target for double-buffered blocks
_VMEM_LIMIT_BYTES = 48 * 1024 * 1024   # < v7x 64 MiB physical; << v5e/v6e 128 MiB


def _round_up(x: int, m: int) -> int:
    return ((x + m - 1) // m) * m


def _cdiv(a: int, b: int) -> int:
    return -(-a // b)


def _largest_divisor_tile(total: int, cap: int, align: int) -> int:
    """Largest multiple of `align` that divides `total` and is <= cap.
    `total` must itself be a multiple of `align`."""
    if total <= cap:
        return total
    best = align
    t = align
    while t <= cap:
        if total % t == 0:
            best = t
        t += align
    return best


# ---------------------------------------------------------------------------
# Kernels
# ---------------------------------------------------------------------------
def _ff_fused_kernel(x_ref, w_ref, b_ref, o_ref):
    # x: (tm, F)  w: (F, tn)  b: (1, tn) f32  o: (tm, tn)
    y = jnp.dot(x_ref[...], w_ref[...], preferred_element_type=jnp.float32)
    o_ref[...] = jnp.maximum(y + b_ref[...], 0.0).astype(o_ref.dtype)


def _ff_acc_kernel(x_ref, w_ref, b_ref, o_ref, acc_ref):
    # x: (tm, tk)  w: (tk, tn)  b: (1, tn) f32  o: (tm, tn)  acc: (tm, tn) f32
    k = pl.program_id(2)
    prod = jnp.dot(x_ref[...], w_ref[...], preferred_element_type=jnp.float32)

    @pl.when(k == 0)
    def _():
        acc_ref[...] = prod            # first K step writes; no zero-init pass

    @pl.when(k != 0)
    def _():
        acc_ref[...] += prod

    @pl.when(k == pl.num_programs(2) - 1)
    def _():
        o_ref[...] = jnp.maximum(acc_ref[...] + b_ref[...], 0.0
                                 ).astype(o_ref.dtype)


# ---------------------------------------------------------------------------
# Parameter prep (once per model, NOT once per forward call)
# ---------------------------------------------------------------------------
def prepare_ff_body_params(w_t, b, *, compute_dtype=None):
    """Pad H to a multiple of 128 and (optionally) cast W to the compute
    dtype once, so forward calls never rewrite the weight in HBM.

    w_t: [F, H]  transpose of the PyTorch Linear weight
    b:   [H]
    Returns (w_pad [F, Hp], b_pad [1, Hp] f32, H).
    """
    F, H = w_t.shape
    Hp = _round_up(H, 128)
    w_pad = jnp.pad(w_t, ((0, 0), (0, Hp - H)))
    if compute_dtype is not None:
        w_pad = w_pad.astype(compute_dtype)
    b_pad = jnp.pad(b, (0, Hp - H)).reshape(1, Hp).astype(jnp.float32)
    return w_pad, b_pad, H


def init_ff_body_params(key, obs_num_features, fc_hidden_layer_size):
    """Mimics PyTorch nn.Linear default init:
    uniform(-1/sqrt(fan_in), 1/sqrt(fan_in)) for both weight and bias."""
    kw, kb = jax.random.split(key)
    bound = 1.0 / jnp.sqrt(jnp.float32(obs_num_features))
    w_t = jax.random.uniform(
        kw, (obs_num_features, fc_hidden_layer_size),
        minval=-bound, maxval=bound, dtype=jnp.float32)
    b = jax.random.uniform(
        kb, (fc_hidden_layer_size,),
        minval=-bound, maxval=bound, dtype=jnp.float32)
    return w_t, b


# ---------------------------------------------------------------------------
# Forward
# ---------------------------------------------------------------------------
@functools.partial(jax.jit,
                   static_argnames=("hidden_size", "out_dtype", "force_k_grid"))
def ff_body_forward(x, w_pad, b_pad, hidden_size, out_dtype=None, *,
                    force_k_grid=False):
    """ReLU(x @ W + b) as a Pallas TPU kernel.

    x:        [B, F]   activations
    w_pad:    [F, Hp]  weight, H pre-padded to a multiple of 128; its dtype
                       sets the MXU input dtype (bf16 valid on v5e/v6e/v7x).
    b_pad:    [1, Hp]  f32 bias
    hidden_size: logical H (static)
    """
    B, F = x.shape
    F2, Hp = w_pad.shape
    assert F == F2 and Hp % 128 == 0 and hidden_size <= Hp
    out_dtype = x.dtype if out_dtype is None else out_dtype

    compute_dtype = w_pad.dtype
    if x.dtype != compute_dtype:
        x = x.astype(compute_dtype)
    x_isz = jnp.dtype(compute_dtype).itemsize
    o_isz = jnp.dtype(out_dtype).itemsize

    # --- tile sizes --------------------------------------------------------
    # Sub-32-bit inputs pack rows along sublanes: keep the M tile a multiple
    # of 16 in bf16 (32 for 8-bit), 8 in f32, so X loads stay unmasked.
    b_align = 8 if x_isz >= 4 else (16 if x_isz == 2 else 32)
    # Minimize B padding: smallest tile count for the cap, then even split.
    m_cap = 512
    nbt = max(1, _cdiv(B, m_cap))
    tile_b = _round_up(_cdiv(B, nbt), b_align)
    Bp = _round_up(B, tile_b)
    # N tile: multiple of 128 (lane-dense stores), up to 1024.
    tile_n = _largest_divisor_tile(Hp, 1024, 128)

    def plan_bytes(tb, tk, tn):
        # double-buffered X, W, bias and output blocks
        return 2 * (tb * tk * x_isz + tk * tn * x_isz + tn * 4 + tb * tn * o_isz)

    use_fused = (not force_k_grid) and plan_bytes(tile_b, F, tile_n) <= _VMEM_PLAN_BYTES

    if use_fused:
        # ---------------- fused path: no K axis, no accumulator ------------
        nbt = Bp // tile_b
        nht = Hp // tile_n
        # v7x megacore: if the grid collapsed to a single step but Hp is wide
        # enough, split the H tile so the second TensorCore gets work while
        # keeping tile_n >= 256 (full-width v6e/v7x MXU).
        if nbt * nht < 2 and tile_n >= 512 and tile_n % 256 == 0:
            tile_n //= 2
            nht = Hp // tile_n

        if Bp != B:
            x = jnp.pad(x, ((0, Bp - B), (0, 0)))

        # Grid ordered (H-tiles, B-tiles) with B innermost: the W column
        # block's index only changes with j, so W is streamed from HBM
        # exactly once and stays VMEM-resident across all B tiles.
        cost = pl.CostEstimate(
            flops=2 * Bp * F * Hp,
            transcendentals=0,
            bytes_accessed=(nht * Bp * F * x_isz     # X re-read once per H tile
                            + F * Hp * x_isz         # W streamed exactly once
                            + Hp * 4                 # bias
                            + Bp * Hp * o_isz),      # output
        )
        out_p = pl.pallas_call(
            _ff_fused_kernel,
            out_shape=jax.ShapeDtypeStruct((Bp, Hp), out_dtype),
            grid_spec=pltpu.PrefetchScalarGridSpec(
                num_scalar_prefetch=0,
                grid=(nht, nbt),
                in_specs=[
                    pl.BlockSpec((tile_b, F), lambda j, i: (i, 0)),   # X
                    pl.BlockSpec((F, tile_n), lambda j, i: (0, j)),   # W
                    pl.BlockSpec((1, tile_n), lambda j, i: (0, j)),   # bias
                ],
                out_specs=pl.BlockSpec((tile_b, tile_n), lambda j, i: (i, j)),
            ),
            compiler_params=pltpu.CompilerParams(
                dimension_semantics=("parallel", "parallel"),
                vmem_limit_bytes=_VMEM_LIMIT_BYTES,
            ),
            cost_estimate=cost,
        )(x, w_pad, b_pad)
        return out_p[:B, :hidden_size]

    # -------------------- K-grid fallback (very large F) -------------------
    # Rare for a DQN body; per-call F padding of x / W is accepted here.
    nkt = max(1, _cdiv(F, 1024))
    tile_k = _round_up(_cdiv(F, nkt), 128)
    Fp = _round_up(F, tile_k)
    tile_n = _largest_divisor_tile(Hp, 512, 128)
    m_cap_k = 256
    nbt = max(1, _cdiv(B, m_cap_k))
    tile_b = _round_up(_cdiv(B, nbt), b_align)
    Bp = _round_up(B, tile_b)

    xp = x
    if Bp != B or Fp != F:
        xp = jnp.pad(x, ((0, Bp - B), (0, Fp - F)))
    wp = w_pad
    if Fp != F:
        wp = jnp.pad(w_pad, ((0, Fp - F), (0, 0)))

    nbt, nht, nkt = Bp // tile_b, Hp // tile_n, Fp // tile_k
    cost = pl.CostEstimate(
        flops=2 * Bp * Fp * Hp,
        transcendentals=0,
        bytes_accessed=(nht * Bp * Fp * x_isz      # X re-read per H tile
                        + nbt * Fp * Hp * x_isz    # W re-read per B tile
                        + nbt * Hp * 4             # bias
                        + Bp * Hp * o_isz),        # output
    )
    out_p = pl.pallas_call(
        _ff_acc_kernel,
        out_shape=jax.ShapeDtypeStruct((Bp, Hp), out_dtype),
        grid_spec=pltpu.PrefetchScalarGridSpec(
            num_scalar_prefetch=0,
            grid=(nbt, nht, nkt),
            in_specs=[
                pl.BlockSpec((tile_b, tile_k), lambda i, j, k: (i, k)),  # X
                pl.BlockSpec((tile_k, tile_n), lambda i, j, k: (k, j)),  # W
                pl.BlockSpec((1, tile_n), lambda i, j, k: (0, j)),       # bias
            ],
            out_specs=pl.BlockSpec((tile_b, tile_n), lambda i, j, k: (i, j)),
            scratch_shapes=[pltpu.VMEM((tile_b, tile_n), jnp.float32)],
        ),
        compiler_params=pltpu.CompilerParams(
            dimension_semantics=("parallel", "parallel", "arbitrary"),
            vmem_limit_bytes=_VMEM_LIMIT_BYTES,
        ),
        cost_estimate=cost,
    )(xp, wp, b_pad)
    return out_p[:B, :hidden_size]


# ---------------------------------------------------------------------------
if __name__ == "__main__":
    obs_num_features = 32       # F
    fc_hidden_layer_size = 64   # H
    batch = 8

    key = jax.random.PRNGKey(0)
    kx, kp, kx2 = jax.random.split(key, 3)

    x = jax.random.normal(kx, (batch, obs_num_features), dtype=jnp.float32)
    w_t, b = init_ff_body_params(kp, obs_num_features, fc_hidden_layer_size)
    ref = jnp.maximum(x @ w_t + b, 0.0)

    # 1) f32 fused single-step path (the actual ffBody regime).
    w_pad, b_pad, H = prepare_ff_body_params(w_t, b)
    out = jax.block_until_ready(ff_body_forward(x, w_pad, b_pad, H))
    assert out.shape == (batch, fc_hidden_layer_size)
    assert jnp.allclose(out, ref, atol=1e-5, rtol=1e-5)

    # 2) bf16 MXU inputs (valid on v5e/v6e/v7x; accumulate/bias/ReLU stay f32).
    w_bf, b_bf, _ = prepare_ff_body_params(w_t, b, compute_dtype=jnp.bfloat16)
    out_bf = jax.block_until_ready(
        ff_body_forward(x, w_bf, b_bf, H, out_dtype=jnp.float32))
    assert jnp.allclose(out_bf, ref, atol=5e-2, rtol=5e-2)

    # 3) Ragged batch (exercises B padding; still the fused path).
    x_rag = jax.random.normal(kx2, (37, obs_num_features), dtype=jnp.float32)
    out_rag = jax.block_until_ready(ff_body_forward(x_rag, w_pad, b_pad, H))
    ref_rag = jnp.maximum(x_rag @ w_t + b, 0.0)
    assert out_rag.shape == (37, fc_hidden_layer_size)
    assert jnp.allclose(out_rag, ref_rag, atol=1e-5, rtol=1e-5)

    # 4) Wider hidden layer: multi H-tile fused grid (v7x megacore split).
    w_t2, b2 = init_ff_body_params(kp, obs_num_features, 512)
    w2_pad, b2_pad, H2 = prepare_ff_body_params(w_t2, b2)
    x2 = jax.random.normal(kx, (64, obs_num_features), dtype=jnp.float32)
    out2 = jax.block_until_ready(ff_body_forward(x2, w2_pad, b2_pad, H2))
    ref2 = jnp.maximum(x2 @ w_t2 + b2, 0.0)
    assert jnp.allclose(out2, ref2, atol=1e-5, rtol=1e-5)

    # 5) Large-F fallback (K-grid accumulator path), forced for coverage.
    F_big, H_big, B_big = 1152, 192, 24
    kxb, kpb = jax.random.split(jax.random.PRNGKey(1))
    x_big = jax.random.normal(kxb, (B_big, F_big), dtype=jnp.float32)
    w_big, b_big = init_ff_body_params(kpb, F_big, H_big)
    wb_pad, bb_pad, Hb = prepare_ff_body_params(w_big, b_big)
    out_k = jax.block_until_ready(
        ff_body_forward(x_big, wb_pad, bb_pad, Hb, force_k_grid=True))
    ref_k = jnp.maximum(
        jax.lax.dot(x_big, w_big,
                    precision=jax.lax.Precision.HIGHEST) + b_big, 0.0)
    assert out_k.shape == (B_big, H_big)
    assert jnp.allclose(out_k, ref_k, atol=1e-2, rtol=1e-2)

    print("KERNEL_OK")
</pallas_src>

<mosaic_0001>
module attributes {stable_mosaic.version = 11 : i64} {
  func.func @_ff_fused_kernel(%arg0: i32, %arg1: i32, %arg2: memref<8x32xf32, #tpu.memory_space<vmem>>, %arg3: memref<32x128xf32, #tpu.memory_space<vmem>>, %arg4: memref<1x128xf32, #tpu.memory_space<vmem>>, %arg5: memref<8x128xf32, #tpu.memory_space<vmem>>) attributes {dimension_semantics = [#tpu.dimension_semantics<parallel>, #tpu.dimension_semantics<parallel>], iteration_bounds = array<i64: 1, 1>, scalar_prefetch = 0 : i64, scratch_operands = 0 : i64, tpu.core_type = #tpu.core_type<tc>, window_params = [{transform_indices = @transform_0, window_bounds = array<i64: 8, 32>}, {transform_indices = @transform_1, window_bounds = array<i64: 32, 128>}, {transform_indices = @transform_2, window_bounds = array<i64: 1, 128>}, {transform_indices = @transform_3, window_bounds = array<i64: 8, 128>}]} {
    %c0 = arith.constant 0 : index
    %c0_0 = arith.constant 0 : index
    %0 = vector.load %arg2[%c0, %c0_0] : memref<8x32xf32, #tpu.memory_space<vmem>>, vector<8x32xf32>
    %c0_1 = arith.constant 0 : index
    %c0_2 = arith.constant 0 : index
    %1 = vector.load %arg3[%c0_1, %c0_2] : memref<32x128xf32, #tpu.memory_space<vmem>>, vector<32x128xf32>
    %cst = arith.constant dense<0.000000e+00> : vector<8x128xf32>
    %2 = tpu.matmul %0, %1, %cst {dimension_numbers = #tpu.dot_dimension_numbers<[1], [0], [0], [1], [0, 0, 1, 1], [], []>} : vector<8x32xf32>, vector<32x128xf32>, vector<8x128xf32> -> vector<8x128xf32>
    %c0_3 = arith.constant 0 : index
    %c0_4 = arith.constant 0 : index
    %3 = vector.load %arg4[%c0_3, %c0_4] : memref<1x128xf32, #tpu.memory_space<vmem>>, vector<1x128xf32>
    %4 = vector.broadcast %3 : vector<1x128xf32> to vector<8x128xf32>
    %5 = arith.addf %2, %4 : vector<8x128xf32>
    %cst_5 = arith.constant 0.000000e+00 : f32
    %6 = vector.broadcast %cst_5 : f32 to vector<8x128xf32>
    %7 = arith.maximumf %5, %6 : vector<8x128xf32>
    %c0_6 = arith.constant 0 : index
    %c0_7 = arith.constant 0 : index
    %8 = vector.load %arg5[%c0_6, %c0_7] : memref<8x128xf32, #tpu.memory_space<vmem>>, vector<8x128xf32>
    tpu.vector_store %arg5[%c0_6, %c0_7], %7 {strides = array<i32>} : memref<8x128xf32, #tpu.memory_space<vmem>>, vector<8x128xf32>,
    return
  }
  func.func @transform_0(%arg0: i32, %arg1: i32) -> (i32, i32) {
    %c0_i32 = arith.constant 0 : i32
    %c0_i32_0 = arith.constant 0 : i32
    return %arg1, %c0_i32 : i32, i32
  }
  func.func @transform_1(%arg0: i32, %arg1: i32) -> (i32, i32) {
    %c0_i32 = arith.constant 0 : i32
    %c0_i32_0 = arith.constant 0 : i32
    return %c0_i32, %arg0 : i32, i32
  }
  func.func @transform_2(%arg0: i32, %arg1: i32) -> (i32, i32) {
    %c0_i32 = arith.constant 0 : i32
    %c0_i32_0 = arith.constant 0 : i32
    return %c0_i32, %arg0 : i32, i32
  }
  func.func @transform_3(%arg0: i32, %arg1: i32) -> (i32, i32) {
    %c0_i32 = arith.constant 0 : i32
    return %arg1, %arg0 : i32, i32
  }
}

</mosaic_0001>

<bundles_post_ra>
// kernel: ff_body_forward.1
= control target key start
LH: loop header
LB: loop body
LE: loop exit
PB: predicated region body
PF: predicated region fallthrough
CT: control target
= control target key end

     0   :  { %8 = vsyncpa [#allocation3], 0  ;;  %s323_s0 = inlined_call_operand.hbm [shape: f32[8,32], index: 0, kind: input, shape index: {}]   ;;  %s324_s1 = inlined_call_operand.hbm [shape: f32[32,128], index: 1, kind: input, shape index: {}]   ;;  %s325_s2 = inlined_call_operand.vmem [shape: f32[1,128], index: 2, kind: input, shape index: {}]   ;;  %s326_s3 = inlined_call_operand.hbm [shape: f32[8,128], index: 3, kind: output, shape index: {}]  }
   0x1   :  { %9 = vsyncpa [#allocation6], 0 }
   0x2   :  { %10 = vsyncpa [#allocation4], 0  ;;  %s249_s12 = smov [#allocation2]   ;;  %s250_s14 = smov [#allocation5]  }
   0x3   :  { %s17_s13 = sshll.u32 %s249_s12, 4  ;;  %s26_s15 = sshll.u32 %s250_s14, 4  ;;  %s18_s13 = int_to_ptr.vmem [resolvable:$true] %s17_s13  ;;  %s277_s15 = int_to_ptr.vmem [resolvable:$true] %s26_s15 }
   0x4   :  { %s177_s18 = scalar_lea.hbm %s323_s0, 128 }
   0x5   :  { %p178_p0 = scmp.ne.s32.totalorder %s323_s0, %s177_s18  ;;  %p181_p1 = scmp.lt.u32.totalorder %s177_s18, %s323_s0 }
   0x7   :  { %p183_p2 = pnand %p181_p1, %p178_p0 }
   0x9   :  { %186 = shalt.err (!%p183_p2)
}
   0xa   :  { %s187_s23 = scalar_lea.vmem %s18_s13, 128  ;;  %p192_p4 = scmp.lt.s32.totalorder %s18_s13, %s18_s13 }
   0xb   :  { %p188_p3 = scmp.ne.s32.totalorder %s18_s13, %s187_s23  ;;  %p193_p5 = scmp.lt.s32.totalorder %s187_s23, %s187_s23 }
   0xd   :  { %p194_p6 = por %p193_p5, %p192_p4 }
   0xf   :  { %p195_p7 = pnand %p194_p6, %p188_p3 }
  0x11   :  { %198 = shalt.err (!%p195_p7)
}
  0x12   :  { %20 = dma.hbm_to_vmem [thread:$0]  %s323_s0, 128, %s18_s13, [#allocation3]  }
  0x13   :  { %s199_s28 = scalar_lea.hbm %s324_s1, 512 }
  0x14   :  { %p200_p8 = scmp.ne.s32.totalorder %s324_s1, %s199_s28  ;;  %p203_p9 = scmp.lt.u32.totalorder %s199_s28, %s324_s1 }
  0x16   :  { %p205_p10 = pnand %p203_p9, %p200_p8 }
  0x18   :  { %208 = shalt.err (!%p205_p10)
}
  0x19   :  { %s209_s6 = scalar_lea.vmem %s277_s15, 512  ;;  %p214_p12 = scmp.lt.s32.totalorder %s277_s15, %s277_s15 }
  0x1a   :  { %p210_p11 = scmp.ne.s32.totalorder %s277_s15, %s209_s6  ;;  %p215_p13 = scmp.lt.s32.totalorder %s209_s6, %s209_s6 }
  0x1c   :  { %p216_p0 = por %p215_p13, %p214_p12 }
  0x1e   :  { %p217_p1 = pnand %p216_p0, %p210_p11 }
  0x20   :  { %220 = shalt.err (!%p217_p1)
}
  0x21   :  { %s251_s0 = smov 128   ;;  %s252_s7 = smov 8  }
  0x22   :  { %32 = dma.hbm_to_vmem [thread:$0]  %s324_s1, 512, %s277_s15, [#allocation6], %s251_s0, %s251_s0, %s252_s7  }
  0x23   :  { %243 = dma.done.wait [#allocation3], 128  }
  0x24   :  { %244 = vsyncadd [#allocation3], 4294967168 }
  0x25   :  { %245 = dma.done.wait [#allocation6], 512  }
  0x26   :  { %246 = vsyncadd [#allocation6], 4294966784  ;;  %v253_v0 = vmov 0.0|0.0   ;;  %vm254_vm0 = vmmov 0   ;;  %v255_v1 = vmov 0.0   ;;  %v42_v2 = vld [vmem:[#allocation5] sm:$0xff] }
  0x27   :  { %163 = vmatprep.subr.bf16.mxu0 %v253_v0  ;;  %160 = vmatprep.mubr.msk.f32.mxu0 %vm254_vm0, %v255_v1  ;;  %v43_v3 = vld [vmem:[#allocation5 + $0x8] sm:$0xff]  ;;  %v44_v4 = vld [vmem:[#allocation5 + $0x10] sm:$0xff]  ;;  %v45_v6 = vld [vmem:[#allocation5 + $0x18] sm:$0xff]  ;;  %vm53_vm1 = vcmask 261120   ;;  %s256_s11 = smov [#allocation7]  }
  0x28   :  { %v164_v5 = vpack.c.bf16 %v43_v3, %v42_v2  ;;  %v167_v7 = vpack.c.bf16 %v45_v6, %v44_v4  ;;  %v41_v8 = vld [vmem:[#allocation2] sm:$0xff]  ;;  %s135_s12 = sshll.u32 %s256_s11, 4  ;;  %s136_s12 = int_to_ptr.vmem [resolvable:$true] %s135_s12 }
  0x29   :  { %v145_v9 = vld [vmem:[%s325_s2] ss:$0 sm:$0xff]  ;;  %s221_s13 = scalar_lea.vmem %s136_s12, 128  ;;  %p226_p3 = scmp.lt.s32.totalorder %s136_s12, %s136_s12 }
  0x2a   :  { %165 = vmatpush3.bf16.msra.mxu0 %v164_v5  ;;  %p222_p2 = scmp.ne.s32.totalorder %s136_s12, %s221_s13  ;;  %p227_p4 = scmp.lt.s32.totalorder %s221_s13, %s221_s13 }
  0x2b   :  { %166 = vmatprep.subr.bf16.mxu0 %v253_v0 }
  0x2c   :  { %p228_p5 = por %p227_p4, %p226_p3 }
  0x2e   :  { %168 = vmatpush3.bf16.msra.mxu0 %v167_v7  ;;  %p229_p6 = pnand %p228_p5, %p222_p2 }
  0x31   :  { %161 = vmatmul.mubr.msk.f32.vlgmr.msra.gmra.mrb[0].mxu0 %vm53_vm1, %v41_v8 }
 0x104   :  { %v123_v10 = vpop.f32.mrb[0].mxu0 }
 0x105   :  { %v124_v11 = vadd.f32 %v145_v9, %v123_v10  ;;  %v162_v12 = vpop.f32.mrb[1].mxu0 }
 0x107   :  { %v127_v13 = vmax.f32 %v124_v11, 0.0 }
 0x109   :  { %128 = vst [vmem:[#allocation7] sm:$0xff] %v127_v13 }
 0x10a   :  { %232 = shalt.err (!%p229_p6)
}
 0x10b   :  { %s233_s16 = scalar_lea.hbm %s326_s3, 128 }
 0x10c   :  { %p234_p7 = scmp.ne.s32.totalorder %s326_s3, %s233_s16  ;;  %p237_p8 = scmp.lt.u32.totalorder %s233_s16, %s326_s3 }
 0x10e   :  { %p239_p9 = pnand %p237_p8, %p234_p7 }
 0x110   :  { %242 = shalt.err (!%p239_p9)
}
 0x111   :  { %138 = dma.vmem_to_hbm [thread:$0]  %s136_s12, 128, %s326_s3, [#allocation4]  }
 0x112   :  { %247 = dma.done.wait [#allocation4], 128  }
 0x113   :  { %248 = vsyncadd [#allocation4], 4294967168 }
 0x114   :  { %142 = vsyncpa [#allocation3], 1 }
 0x115   :  { %143 = vsyncpa [#allocation6], 1 }
 0x116   :  { %144 = vsyncpa [#allocation4], 1 }

</bundles_post_ra>
